<compile_context>
chip_gen: v7x
topology: tpu7x:2x2x1
jax: 0.10.0
libtpu: 0.0.40
codegen_flags: <defaults>
</compile_context>

<pallas_src>
import functools

import jax
import jax.numpy as jnp
from jax.experimental import pallas as pl
from jax.experimental.pallas import tpu as pltpu

F32 = jnp.float32
BF16 = jnp.bfloat16


# ----------------------------------------------------------------------------
# Fused Pallas kernel: conv1 -> relu -> conv2 -> relu -> GConvLSTM -> relu -> Linear
# ----------------------------------------------------------------------------
def fused_forward_kernel(a_ref, dinv_ref, dinvc_ref, x_ref,
                         w1_ref, b1_ref, w2_ref, b2_ref,
                         wall_ref, bg_ref, wc_ref,
                         h_ref, c_ref,
                         wlin_ref, blin_ref,
                         o_ref):
    A = a_ref[...]            # (N, N) bf16   raw weighted adjacency (no norm, no self-loops)
    dinv = dinv_ref[...]      # (N, 1) f32    D_hat^{-1/2} of (A + I)   (GCNConv norm)
    dinvc = dinvc_ref[...]    # (N, 1) f32    D^{-1/2} of A             (ChebConv norm)
    X = x_ref[...]            # (N, Fin) f32
    H = h_ref[...]            # (N, Fh)  f32
    C = c_ref[...]            # (N, Fh)  f32
    Fh = H.shape[1]

    def gcn_prop(Z):
        # A_gcn @ Z = dinv * (A @ (dinv * Z)) + dinv^2 * Z   (normalization folded in)
        Zs = (dinv * Z).astype(BF16)
        return dinv * jnp.dot(A, Zs, preferred_element_type=F32) + (dinv * dinv) * Z

    def cheb_prop(Z):
        # L_hat @ Z = -dinvc * (A @ (dinvc * Z))    (sym norm, lambda_max = 2)
        Zs = (dinvc * Z).astype(BF16)
        return -dinvc * jnp.dot(A, Zs, preferred_element_type=F32)

    # ---- conv1 + relu :  relu( A_gcn @ (X @ W1) + b1 ) ----
    xw1 = jnp.dot(X.astype(BF16), w1_ref[...], preferred_element_type=F32)
    x1 = jnp.maximum(gcn_prop(xw1) + b1_ref[...], 0.0)

    # ---- conv2 + relu :  relu( A_gcn @ (x1 @ W2) + b2 ) ----
    xw2 = jnp.dot(x1.astype(BF16), w2_ref[...], preferred_element_type=F32)
    x2 = jnp.maximum(gcn_prop(xw2) + b2_ref[...], 0.0)

    # ---- GConvLSTM cell (ChebConv K=2, lambda_max=2 => T0 = Z, T1 = L_hat @ Z) ----
    # Single width-48 propagation matmul for both L@x2 and L@H.
    ZH = jnp.concatenate([x2, H], axis=1)          # (N, Fx + Fh) = (N, 48)
    LZH = cheb_prop(ZH)                            # (N, 48)  = [L@x2 | L@H]

    # One wide gate matmul:  [x2 | H | L@x2 | L@H] (N,96) @ W_all (96, 4*Fh).
    Zall = jnp.concatenate([ZH, LZH], axis=1).astype(BF16)
    pre = jnp.dot(Zall, wall_ref[...], preferred_element_type=F32) + bg_ref[...]

    wc = wc_ref[...]          # (3, Fh) peephole weights [w_c_i, w_c_f, w_c_o]
    p_i = pre[:, 0 * Fh:1 * Fh]
    p_f = pre[:, 1 * Fh:2 * Fh]
    p_c = pre[:, 2 * Fh:3 * Fh]
    p_o = pre[:, 3 * Fh:4 * Fh]

    gate_i = jax.nn.sigmoid(p_i + wc[0:1, :] * C)
    gate_f = jax.nn.sigmoid(p_f + wc[1:2, :] * C)
    t_cell = jnp.tanh(p_c)
    c_new = gate_f * C + gate_i * t_cell
    gate_o = jax.nn.sigmoid(p_o + wc[2:3, :] * c_new)
    h_new = gate_o * jnp.tanh(c_new)

    # ---- final Linear on relu(h) ----
    out_lin = (jnp.dot(jnp.maximum(h_new, 0.0).astype(BF16), wlin_ref[...],
                       preferred_element_type=F32) + blin_ref[...])

    # ---- lane-dense packed writeback [out | h_new | c_new | 0-pad]:
    # zero the pad once, then direct sub-slice stores (no concat/shuffle).
    oc = out_lin.shape[1]
    o_ref[...] = jnp.zeros(o_ref.shape, F32)
    o_ref[:, 0:oc] = out_lin
    o_ref[:, oc:oc + Fh] = h_new
    o_ref[:, oc + Fh:oc + 2 * Fh] = c_new


# ----------------------------------------------------------------------------
# pallas_call wrapper (whole problem fits in VMEM at these sizes -> one block)
# ----------------------------------------------------------------------------
def _vmem_limit_bytes():
    # Per-generation VMEM budget: 3/4 of physical (v7x 64 MiB -> 48, v5e/v6e 128 -> 96).
    try:
        cap = pltpu.get_tpu_info().vmem_capacity_bytes
    except Exception:
        cap = 64 * 1024 * 1024
    return max(32 * 1024 * 1024, int(cap) * 3 // 4)


def _fused_call(inputs, N, P_pad, Fin, Fh, out_channels):
    c1, c2 = 64, 32
    # Dominant cost: three passes of the N x N matrix (widths 64, 32, 48).
    flops = (2 * N * N * (c1 + c2 + (c2 + Fh))
             + 2 * N * (Fin * c1 + c1 * c2 + 2 * (c2 + Fh) * 4 * Fh + Fh * out_channels))
    transcendentals = 5 * N * Fh
    bytes_accessed = (N * N * 2                                  # adjacency (bf16), read once
                      + 4 * N * (Fin + 4 * Fh + P_pad + 2)       # features / state / output / degs
                      + 2 * (Fin * c1 + c1 * c2 + 2 * (c2 + Fh) * 4 * Fh + Fh * out_channels))
    return pl.pallas_call(
        fused_forward_kernel,
        out_shape=jax.ShapeDtypeStruct((N, P_pad), F32),
        compiler_params=pltpu.CompilerParams(
            vmem_limit_bytes=_vmem_limit_bytes()),
        cost_estimate=pl.CostEstimate(flops=int(flops),
                                      transcendentals=int(transcendentals),
                                      bytes_accessed=int(bytes_accessed)),
    )(*inputs)


# ----------------------------------------------------------------------------
# Dense adjacency + normalization vectors (plain-JAX glue)
# ----------------------------------------------------------------------------
def build_propagation_inputs(edge_index, edge_attr, num_nodes):
    src, dst = edge_index[0], edge_index[1]
    A = jnp.zeros((num_nodes, num_nodes), F32).at[dst, src].add(edge_attr)

    # GCNConv normalization degrees (self-loops added): deg(A + I).
    # NOTE: for asymmetric edge weights, PyG's gcn_norm degree convention should be
    # re-checked; for the symmetric demo graph row/col sums coincide.
    deg = A.sum(axis=1) + 1.0
    dinv = jnp.where(deg > 0, 1.0 / jnp.sqrt(deg), 0.0)

    # ChebConv scaled Laplacian degrees (sym norm, lambda_max = 2).
    deg_c = A.sum(axis=0)
    dinv_c = jnp.where(deg_c > 0, 1.0 / jnp.sqrt(deg_c), 0.0)

    # O(N^2) operand -> bf16 (halves HBM/VMEM traffic, 2x MXU throughput on v6e/v7x).
    return A.astype(BF16), dinv[:, None], dinv_c[:, None]


# ----------------------------------------------------------------------------
# Full forward pass
# ----------------------------------------------------------------------------
def node_roles_gcn_forward(params, x, edge_index, edge_attr, h, c):
    N = x.shape[0]
    Fh = h.shape[1]
    Fin = x.shape[1]
    out_channels = params["Wlin"].shape[1]

    A_bf, dinv, dinv_c = build_propagation_inputs(edge_index, edge_attr, N)

    # Repack GConvLSTM weights into ONE lane-dense (96, 4*Fh) slab, row order
    # [Wx0; Wh0; Wx1; Wh1] matching the kernel's concat([x2, H, L@x2, L@H]).
    Wx, Wh = params["Wx"], params["Wh"]          # (4, 2, Fx, Fh), (4, 2, Fh, Fh)
    Fx = Wx.shape[2]
    Wx0 = jnp.transpose(Wx[:, 0], (1, 0, 2)).reshape(Fx, 4 * Fh)
    Wx1 = jnp.transpose(Wx[:, 1], (1, 0, 2)).reshape(Fx, 4 * Fh)
    Wh0 = jnp.transpose(Wh[:, 0], (1, 0, 2)).reshape(Fh, 4 * Fh)
    Wh1 = jnp.transpose(Wh[:, 1], (1, 0, 2)).reshape(Fh, 4 * Fh)
    W_all = jnp.concatenate([Wx0, Wh0, Wx1, Wh1], axis=0).astype(BF16)
    bgate = (params["bx"] + params["bh"] + params["bg"]).reshape(1, 4 * Fh)
    wc = params["wc"]                            # (3, Fh)

    # Packed, 128-lane-padded output slab: [out | h_new | c_new | 0-pad].
    P = out_channels + 2 * Fh
    P_pad = max(128, ((P + 127) // 128) * 128)

    inputs = (A_bf, dinv, dinv_c, x,
              params["W1"].astype(BF16), params["b1"],
              params["W2"].astype(BF16), params["b2"],
              W_all, bgate, wc,
              h, c,
              params["Wlin"].astype(BF16), params["blin"])

    slab = _fused_call(inputs, N, P_pad, Fin, Fh, out_channels)

    out = slab[:, :out_channels]
    h_new = slab[:, out_channels:out_channels + Fh]
    c_new = slab[:, out_channels + Fh:out_channels + 2 * Fh]
    return out, h_new, c_new


def init_params(key, in_channels, out_channels):
    ch = [64, 64, 32, 16]
    ks = jax.random.split(key, 12)

    def u(k, shape, scale=0.1):
        return jax.random.uniform(k, shape, F32, -scale, scale)

    return {
        "W1": u(ks[0], (in_channels, ch[0])),
        "b1": u(ks[1], (1, ch[0])),
        "W2": u(ks[2], (ch[1], ch[2])),
        "b2": u(ks[3], (1, ch[2])),
        # GConvLSTM: 4 gates [i, f, c, o], each ChebConv(K=2) on x (32->16) and h (16->16)
        "Wx": u(ks[4], (4, 2, ch[2], ch[3])),
        "Wh": u(ks[5], (4, 2, ch[3], ch[3])),
        "bx": u(ks[6], (4, ch[3])),
        "bh": u(ks[7], (4, ch[3])),
        "wc": u(ks[8], (3, ch[3])),          # peephole weights w_c_{i,f,o}
        "bg": u(ks[9], (4, ch[3])),          # gate biases b_{i,f,c,o}
        "Wlin": u(ks[10], (ch[3], out_channels)),
        "blin": u(ks[11], (1, out_channels)),
    }


if __name__ == "__main__":
    key = jax.random.PRNGKey(0)
    N = 16               # nodes
    in_channels = 8
    out_channels = 4

    k_x, k_w, k_p = jax.random.split(key, 3)

    # Node features.
    x = jax.random.normal(k_x, (N, in_channels), F32)

    # Symmetric ring graph with positive edge weights (edge_attr).
    src = jnp.arange(N, dtype=jnp.int32)
    dst = (src + 1) % N
    edge_index = jnp.stack([jnp.concatenate([src, dst]),
                            jnp.concatenate([dst, src])])         # (2, 2N)
    ew = jax.random.uniform(k_w, (N,), F32, 0.5, 1.5)
    edge_attr = jnp.concatenate([ew, ew])                          # (2N,)

    params = init_params(k_p, in_channels, out_channels)

    # Initial hidden / cell state (module starts with h = c = None -> zeros).
    h0 = jnp.zeros((N, 16), F32)
    c0 = jnp.zeros((N, 16), F32)

    fwd = jax.jit(functools.partial(node_roles_gcn_forward, params))
    out, h, c = fwd(x, edge_index, edge_attr, h0, c0)
    jax.block_until_ready((out, h, c))

    assert out.shape == (N, out_channels)
    assert h.shape == (N, 16) and c.shape == (N, 16)
    assert bool(jnp.all(jnp.isfinite(out)))
    assert bool(jnp.all(jnp.isfinite(h))) and bool(jnp.all(jnp.isfinite(c)))
    print("KERNEL_OK")
</pallas_src>

<mosaic_0001>
module attributes {stable_mosaic.version = 11 : i64} {
  func.func private @main(%arg0: i32) attributes {dimension_semantics = [#tpu.dimension_semantics<core_parallel>], iteration_bounds = array<i64: 2>, tpu.core_type = #tpu.core_type<sc_scalar_subcore>, window_params = []} {
    return
  }
}

module attributes {stable_mosaic.version = 11 : i64} {
  func.func private @main(%arg0: i32) attributes {dimension_semantics = [#tpu.dimension_semantics<core_parallel>], iteration_bounds = array<i64: 2>, tpu.core_type = #tpu.core_type<sc_scalar_subcore>, window_params = []} {
    return
  }
}

module attributes {stable_mosaic.version = 11 : i64} {
  func.func @fused_forward_kernel(%arg0: memref<16x16xbf16, #tpu.memory_space<vmem>>, %arg1: memref<16x1xf32, #tpu.memory_space<vmem>>, %arg2: memref<16x1xf32, #tpu.memory_space<vmem>>, %arg3: memref<16x8xf32, #tpu.memory_space<vmem>>, %arg4: memref<8x64xbf16, #tpu.memory_space<vmem>>, %arg5: memref<1x64xf32, #tpu.memory_space<vmem>>, %arg6: memref<64x32xbf16, #tpu.memory_space<vmem>>, %arg7: memref<1x32xf32, #tpu.memory_space<vmem>>, %arg8: memref<96x64xbf16, #tpu.memory_space<vmem>>, %arg9: memref<1x64xf32, #tpu.memory_space<vmem>>, %arg10: memref<3x16xf32, #tpu.memory_space<vmem>>, %arg11: memref<16x16xf32, #tpu.memory_space<vmem>>, %arg12: memref<16x16xf32, #tpu.memory_space<vmem>>, %arg13: memref<16x4xbf16, #tpu.memory_space<vmem>>, %arg14: memref<1x4xf32, #tpu.memory_space<vmem>>, %arg15: memref<16x128xf32, #tpu.memory_space<vmem>>) attributes {dimension_semantics = [], scalar_prefetch = 0 : i64, scratch_operands = 0 : i64, tpu.core_type = #tpu.core_type<tc>} {
    %c0 = arith.constant 0 : index
    %c0_0 = arith.constant 0 : index
    %0 = vector.load %arg0[%c0, %c0_0] : memref<16x16xbf16, #tpu.memory_space<vmem>>, vector<16x16xbf16>
    %c0_1 = arith.constant 0 : index
    %c0_2 = arith.constant 0 : index
    %1 = vector.load %arg1[%c0_1, %c0_2] : memref<16x1xf32, #tpu.memory_space<vmem>>, vector<16x1xf32>
    %c0_3 = arith.constant 0 : index
    %c0_4 = arith.constant 0 : index
    %2 = vector.load %arg2[%c0_3, %c0_4] : memref<16x1xf32, #tpu.memory_space<vmem>>, vector<16x1xf32>
    %c0_5 = arith.constant 0 : index
    %c0_6 = arith.constant 0 : index
    %3 = vector.load %arg3[%c0_5, %c0_6] : memref<16x8xf32, #tpu.memory_space<vmem>>, vector<16x8xf32>
    %c0_7 = arith.constant 0 : index
    %c0_8 = arith.constant 0 : index
    %4 = vector.load %arg11[%c0_7, %c0_8] : memref<16x16xf32, #tpu.memory_space<vmem>>, vector<16x16xf32>
    %c0_9 = arith.constant 0 : index
    %c0_10 = arith.constant 0 : index
    %5 = vector.load %arg12[%c0_9, %c0_10] : memref<16x16xf32, #tpu.memory_space<vmem>>, vector<16x16xf32>
    %6 = arith.truncf %3 : vector<16x8xf32> to vector<16x8xbf16>
    %c0_11 = arith.constant 0 : index
    %c0_12 = arith.constant 0 : index
    %7 = vector.load %arg4[%c0_11, %c0_12] : memref<8x64xbf16, #tpu.memory_space<vmem>>, vector<8x64xbf16>
    %cst = arith.constant dense<0.000000e+00> : vector<16x64xf32>
    %8 = tpu.matmul %6, %7, %cst {dimension_numbers = #tpu.dot_dimension_numbers<[1], [0], [0], [1], [0, 0, 1, 1], [], []>} : vector<16x8xbf16>, vector<8x64xbf16>, vector<16x64xf32> -> vector<16x64xf32>
    %9 = vector.broadcast %1 : vector<16x1xf32> to vector<16x64xf32>
    %10 = arith.mulf %9, %8 : vector<16x64xf32>
    %11 = arith.truncf %10 : vector<16x64xf32> to vector<16x64xbf16>
    %cst_13 = arith.constant dense<0.000000e+00> : vector<16x64xf32>
    %12 = tpu.matmul %0, %11, %cst_13 {dimension_numbers = #tpu.dot_dimension_numbers<[1], [0], [0], [1], [0, 0, 1, 1], [], []>} : vector<16x16xbf16>, vector<16x64xbf16>, vector<16x64xf32> -> vector<16x64xf32>
    %13 = vector.broadcast %1 : vector<16x1xf32> to vector<16x64xf32>
    %14 = arith.mulf %13, %12 : vector<16x64xf32>
    %15 = arith.mulf %1, %1 : vector<16x1xf32>
    %16 = vector.broadcast %15 : vector<16x1xf32> to vector<16x64xf32>
    %17 = arith.mulf %16, %8 : vector<16x64xf32>
    %18 = arith.addf %14, %17 : vector<16x64xf32>
    %c0_14 = arith.constant 0 : index
    %c0_15 = arith.constant 0 : index
    %19 = vector.load %arg5[%c0_14, %c0_15] : memref<1x64xf32, #tpu.memory_space<vmem>>, vector<1x64xf32>
    %20 = vector.broadcast %19 : vector<1x64xf32> to vector<16x64xf32>
    %21 = arith.addf %18, %20 : vector<16x64xf32>
    %cst_16 = arith.constant 0.000000e+00 : f32
    %22 = vector.broadcast %cst_16 : f32 to vector<16x64xf32>
    %23 = arith.maximumf %21, %22 : vector<16x64xf32>
    %24 = arith.truncf %23 : vector<16x64xf32> to vector<16x64xbf16>
    %c0_17 = arith.constant 0 : index
    %c0_18 = arith.constant 0 : index
    %25 = vector.load %arg6[%c0_17, %c0_18] : memref<64x32xbf16, #tpu.memory_space<vmem>>, vector<64x32xbf16>
    %cst_19 = arith.constant dense<0.000000e+00> : vector<16x32xf32>
    %26 = tpu.matmul %24, %25, %cst_19 {dimension_numbers = #tpu.dot_dimension_numbers<[1], [0], [0], [1], [0, 0, 1, 1], [], []>} : vector<16x64xbf16>, vector<64x32xbf16>, vector<16x32xf32> -> vector<16x32xf32>
    %27 = vector.broadcast %1 : vector<16x1xf32> to vector<16x32xf32>
    %28 = arith.mulf %27, %26 : vector<16x32xf32>
    %29 = arith.truncf %28 : vector<16x32xf32> to vector<16x32xbf16>
    %cst_20 = arith.constant dense<0.000000e+00> : vector<16x32xf32>
    %30 = tpu.matmul %0, %29, %cst_20 {dimension_numbers = #tpu.dot_dimension_numbers<[1], [0], [0], [1], [0, 0, 1, 1], [], []>} : vector<16x16xbf16>, vector<16x32xbf16>, vector<16x32xf32> -> vector<16x32xf32>
    %31 = vector.broadcast %1 : vector<16x1xf32> to vector<16x32xf32>
    %32 = arith.mulf %31, %30 : vector<16x32xf32>
    %33 = arith.mulf %1, %1 : vector<16x1xf32>
    %34 = vector.broadcast %33 : vector<16x1xf32> to vector<16x32xf32>
    %35 = arith.mulf %34, %26 : vector<16x32xf32>
    %36 = arith.addf %32, %35 : vector<16x32xf32>
    %c0_21 = arith.constant 0 : index
    %c0_22 = arith.constant 0 : index
    %37 = vector.load %arg7[%c0_21, %c0_22] : memref<1x32xf32, #tpu.memory_space<vmem>>, vector<1x32xf32>
    %38 = vector.broadcast %37 : vector<1x32xf32> to vector<16x32xf32>
    %39 = arith.addf %36, %38 : vector<16x32xf32>
    %cst_23 = arith.constant 0.000000e+00 : f32
    %40 = vector.broadcast %cst_23 : f32 to vector<16x32xf32>
    %41 = arith.maximumf %39, %40 : vector<16x32xf32>
    %42 = tpu.concatenate %41, %4 in 1 : vector<16x32xf32>, vector<16x16xf32> -> vector<16x48xf32>
    %43 = vector.broadcast %2 : vector<16x1xf32> to vector<16x48xf32>
    %44 = arith.mulf %43, %42 : vector<16x48xf32>
    %45 = arith.truncf %44 : vector<16x48xf32> to vector<16x48xbf16>
    %cst_24 = arith.constant 0.000000e+00 : f32
    %46 = vector.broadcast %cst_24 : f32 to vector<16x1xf32>
    %47 = arith.subf %46, %2 : vector<16x1xf32>
    %cst_25 = arith.constant dense<0.000000e+00> : vector<16x48xf32>
    %48 = tpu.matmul %0, %45, %cst_25 {dimension_numbers = #tpu.dot_dimension_numbers<[1], [0], [0], [1], [0, 0, 1, 1], [], []>} : vector<16x16xbf16>, vector<16x48xbf16>, vector<16x48xf32> -> vector<16x48xf32>
    %49 = vector.broadcast %47 : vector<16x1xf32> to vector<16x48xf32>
    %50 = arith.mulf %49, %48 : vector<16x48xf32>
    %51 = tpu.concatenate %42, %50 in 1 : vector<16x48xf32>, vector<16x48xf32> -> vector<16x96xf32>
    %52 = arith.truncf %51 : vector<16x96xf32> to vector<16x96xbf16>
    %c0_26 = arith.constant 0 : index
    %c0_27 = arith.constant 0 : index
    %53 = vector.load %arg8[%c0_26, %c0_27] : memref<96x64xbf16, #tpu.memory_space<vmem>>, vector<96x64xbf16>
    %cst_28 = arith.constant dense<0.000000e+00> : vector<16x64xf32>
    %54 = tpu.matmul %52, %53, %cst_28 {dimension_numbers = #tpu.dot_dimension_numbers<[1], [0], [0], [1], [0, 0, 1, 1], [], []>} : vector<16x96xbf16>, vector<96x64xbf16>, vector<16x64xf32> -> vector<16x64xf32>
    %c0_29 = arith.constant 0 : index
    %c0_30 = arith.constant 0 : index
    %55 = vector.load %arg9[%c0_29, %c0_30] : memref<1x64xf32, #tpu.memory_space<vmem>>, vector<1x64xf32>
    %56 = vector.broadcast %55 : vector<1x64xf32> to vector<16x64xf32>
    %57 = arith.addf %54, %56 : vector<16x64xf32>
    %c0_31 = arith.constant 0 : index
    %c0_32 = arith.constant 0 : index
    %58 = vector.load %arg10[%c0_31, %c0_32] : memref<3x16xf32, #tpu.memory_space<vmem>>, vector<3x16xf32>
    %59 = vector.extract_strided_slice %57 {offsets = [0, 0], sizes = [16, 16], strides = [1, 1]} : vector<16x64xf32> to vector<16x16xf32>
    %60 = vector.extract_strided_slice %57 {offsets = [0, 16], sizes = [16, 16], strides = [1, 1]} : vector<16x64xf32> to vector<16x16xf32>
    %61 = vector.extract_strided_slice %57 {offsets = [0, 32], sizes = [16, 16], strides = [1, 1]} : vector<16x64xf32> to vector<16x16xf32>
    %62 = vector.extract_strided_slice %57 {offsets = [0, 48], sizes = [16, 16], strides = [1, 1]} : vector<16x64xf32> to vector<16x16xf32>
    %63 = vector.extract_strided_slice %58 {offsets = [0, 0], sizes = [1, 16], strides = [1, 1]} : vector<3x16xf32> to vector<1x16xf32>
    %64 = vector.broadcast %63 : vector<1x16xf32> to vector<16x16xf32>
    %65 = arith.mulf %64, %5 : vector<16x16xf32>
    %66 = arith.addf %59, %65 : vector<16x16xf32>
    %67 = arith.negf %66 : vector<16x16xf32>
    %68 = math.exp %67 : vector<16x16xf32>
    %cst_33 = arith.constant 1.000000e+00 : f32
    %69 = vector.broadcast %cst_33 : f32 to vector<16x16xf32>
    %70 = arith.addf %69, %68 : vector<16x16xf32>
    %71 = arith.divf %69, %70 : vector<16x16xf32>
    %72 = vector.extract_strided_slice %58 {offsets = [1, 0], sizes = [1, 16], strides = [1, 1]} : vector<3x16xf32> to vector<1x16xf32>
    %73 = vector.broadcast %72 : vector<1x16xf32> to vector<16x16xf32>
    %74 = arith.mulf %73, %5 : vector<16x16xf32>
    %75 = arith.addf %60, %74 : vector<16x16xf32>
    %76 = arith.negf %75 : vector<16x16xf32>
    %77 = math.exp %76 : vector<16x16xf32>
    %cst_34 = arith.constant 1.000000e+00 : f32
    %78 = vector.broadcast %cst_34 : f32 to vector<16x16xf32>
    %79 = arith.addf %78, %77 : vector<16x16xf32>
    %80 = arith.divf %78, %79 : vector<16x16xf32>
    %81 = math.tanh %61 : vector<16x16xf32>
    %82 = arith.mulf %80, %5 : vector<16x16xf32>
    %83 = arith.mulf %71, %81 : vector<16x16xf32>
    %84 = arith.addf %82, %83 : vector<16x16xf32>
    %85 = vector.extract_strided_slice %58 {offsets = [2, 0], sizes = [1, 16], strides = [1, 1]} : vector<3x16xf32> to vector<1x16xf32>
    %86 = vector.broadcast %85 : vector<1x16xf32> to vector<16x16xf32>
    %87 = arith.mulf %86, %84 : vector<16x16xf32>
    %88 = arith.addf %62, %87 : vector<16x16xf32>
    %89 = arith.negf %88 : vector<16x16xf32>
    %90 = math.exp %89 : vector<16x16xf32>
    %cst_35 = arith.constant 1.000000e+00 : f32
    %91 = vector.broadcast %cst_35 : f32 to vector<16x16xf32>
    %92 = arith.addf %91, %90 : vector<16x16xf32>
    %93 = arith.divf %91, %92 : vector<16x16xf32>
    %94 = math.tanh %84 : vector<16x16xf32>
    %95 = arith.mulf %93, %94 : vector<16x16xf32>
    %cst_36 = arith.constant 0.000000e+00 : f32
    %96 = vector.broadcast %cst_36 : f32 to vector<16x16xf32>
    %97 = arith.maximumf %95, %96 : vector<16x16xf32>
    %98 = arith.truncf %97 : vector<16x16xf32> to vector<16x16xbf16>
    %c0_37 = arith.constant 0 : index
    %c0_38 = arith.constant 0 : index
    %99 = vector.load %arg13[%c0_37, %c0_38] : memref<16x4xbf16, #tpu.memory_space<vmem>>, vector<16x4xbf16>
    %cst_39 = arith.constant dense<0.000000e+00> : vector<16x4xf32>
    %100 = tpu.matmul %98, %99, %cst_39 {dimension_numbers = #tpu.dot_dimension_numbers<[1], [0], [0], [1], [0, 0, 1, 1], [], []>} : vector<16x16xbf16>, vector<16x4xbf16>, vector<16x4xf32> -> vector<16x4xf32>
    %c0_40 = arith.constant 0 : index
    %c0_41 = arith.constant 0 : index
    %101 = vector.load %arg14[%c0_40, %c0_41] : memref<1x4xf32, #tpu.memory_space<vmem>>, vector<1x4xf32>
    %102 = vector.broadcast %101 : vector<1x4xf32> to vector<16x4xf32>
    %103 = arith.addf %100, %102 : vector<16x4xf32>
    %cst_42 = arith.constant 0.000000e+00 : f32
    %104 = vector.broadcast %cst_42 : f32 to vector<16x128xf32>
    %c0_43 = arith.constant 0 : index
    %c0_44 = arith.constant 0 : index
    %105 = vector.load %arg15[%c0_43, %c0_44] : memref<16x128xf32, #tpu.memory_space<vmem>>, vector<16x128xf32>
    tpu.vector_store %arg15[%c0_43, %c0_44], %104 {strides = array<i32>} : memref<16x128xf32, #tpu.memory_space<vmem>>, vector<16x128xf32>,
    %c0_45 = arith.constant 0 : index
    %c0_46 = arith.constant 0 : index
    %106 = vector.load %arg15[%c0_45, %c0_46] : memref<16x128xf32, #tpu.memory_space<vmem>>, vector<16x4xf32>
    tpu.vector_store %arg15[%c0_45, %c0_46], %103 {strides = array<i32>} : memref<16x128xf32, #tpu.memory_space<vmem>>, vector<16x4xf32>,
    %c0_47 = arith.constant 0 : index
    %c4 = arith.constant 4 : index
    %107 = vector.load %arg15[%c0_47, %c4] : memref<16x128xf32, #tpu.memory_space<vmem>>, vector<16x16xf32>
    tpu.vector_store %arg15[%c0_47, %c4], %95 {strides = array<i32>} : memref<16x128xf32, #tpu.memory_space<vmem>>, vector<16x16xf32>,
    %c0_48 = arith.constant 0 : index
    %c20 = arith.constant 20 : index
    %108 = vector.load %arg15[%c0_48, %c20] : memref<16x128xf32, #tpu.memory_space<vmem>>, vector<16x16xf32>
    tpu.vector_store %arg15[%c0_48, %c20], %84 {strides = array<i32>} : memref<16x128xf32, #tpu.memory_space<vmem>>, vector<16x16xf32>,
    return
  }
}

</mosaic_0001>

<bundles_post_ra>
// kernel: node_roles_gcn_forward.1
= control target key start
LH: loop header
LB: loop body
LE: loop exit
PB: predicated region body
PF: predicated region fallthrough
CT: control target
= control target key end

     0   :  { %vm69_vm0 = vcmask 1043456   ;;  %v930_v0 = vmov 0.0   ;;  %vm931_vm1 = vmmov 0   ;;  %v932_v6 = vmov 0   ;;  %s933_s29 = smov 32   ;;  %s935_s24 = smov 96   ;;  %s1204_s4 = inlined_call_operand.vmem [shape: bf16[8,64], index: 4, kind: input, shape index: {}]   ;;  %s1205_s3 = inlined_call_operand.vmem [shape: f32[16,8], index: 3, kind: input, shape index: {}]   ;;  %s1206_s1 = inlined_call_operand.vmem [shape: f32[16,1], index: 1, kind: input, shape index: {}]   ;;  %s1207_s2 = inlined_call_operand.vmem [shape: f32[16,1], index: 2, kind: input, shape index: {}]   ;;  %s1208_s11 = inlined_call_operand.vmem [shape: f32[16,16], index: 11, kind: input, shape index: {}]   ;;  %s1209_s0 = inlined_call_operand.vmem [shape: bf16[16,16], index: 0, kind: input, shape index: {}]   ;;  %s1210_s6 = inlined_call_operand.vmem [shape: bf16[64,32], index: 6, kind: input, shape index: {}]   ;;  %s1211_s5 = inlined_call_operand.vmem [shape: f32[1,64], index: 5, kind: input, shape index: {}]   ;;  %s1212_s7 = inlined_call_operand.vmem [shape: f32[1,32], index: 7, kind: input, shape index: {}]   ;;  %s1213_s8 = inlined_call_operand.vmem [shape: bf16[96,64], index: 8, kind: input, shape index: {}]   ;;  %s1214_s9 = inlined_call_operand.vmem [shape: f32[1,64], index: 9, kind: input, shape index: {}]   ;;  %s1215_s10 = inlined_call_operand.vmem [shape: f32[3,16], index: 10, kind: input, shape index: {}]   ;;  %s1216_s12 = inlined_call_operand.vmem [shape: f32[16,16], index: 12, kind: input, shape index: {}]   ;;  %s1217_s13 = inlined_call_operand.vmem [shape: bf16[16,4], index: 13, kind: input, shape index: {}]   ;;  %s1218_s15 = inlined_call_operand.vmem [shape: f32[16,128], index: 15, kind: output, shape index: {}]   ;;  %s1219_s14 = inlined_call_operand.vmem [shape: f32[1,4], index: 14, kind: input, shape index: {}]  }
   0x1   :  { %810 = vmatprep.subr.bf16.mxu1 %v930_v0  ;;  %v64_v1 = vld [vmem:[%s1204_s4] sm:$0xf]  ;;  %812 = vmatprep.mubr.msk.bf16.mxu1 %vm931_vm1, %v930_v0  ;;  %v58_v3 = vld [vmem:[%s1205_s3 + $0x8] sm:$0xff]  ;;  %vm65_vm2 = vcmask 64512   ;;  %vm132_vm3 = vcmask 130048   ;;  %v889_v29 = vld [vmem:[%s1210_s6 + $0x10] sm:$0xff]   ;;  %730 = vst [vmem:[%s1218_s15] sm:$0xff] %v930_v0 }
   0x2   :  { %v57_v2 = vld [vmem:[%s1205_s3] sm:$0xff]  ;;  %v71_v4 = vsel %vm69_vm0, %v64_v1, 0  ;;  %879 = vset.pattern.permute.xlu0 %v932_v6  ;;  %880 = vset.pattern.permute.xlu1 %v932_v6  ;;  %v54_v9 = vld [vmem:[%s1206_s1 + $0x8] sm:$0xff]  ;;  %v890_v30 = vld [vmem:[%s1210_s6 + $0x18] sm:$0xff]   ;;  %vm239_vm4 = vcmask 523264   ;;  %vm353_vm5 = vcmask 261120  }
   0x3   :  { %v63_v5 = vpack.c.bf16 %v58_v3, %v57_v2  ;;  %v53_v7 = vld [vmem:[%s1206_s1] sm:$0xff]  ;;  %811 = vmatpush3.bf16.msra.mxu1 %v71_v4  ;;  %822 = vmatprep.subr.bf16.mxu0 %v930_v0  ;;  %v180_v10 = vmul.f32 %v54_v9, %v54_v9  ;;  %v56_v14 = vld [vmem:[%s1207_s2 + $0x8] sm:$0xff]  ;;  %vm432_vm6 = vcmask 392192   ;;  %vm491_vm7 = vcmask 785408   ;;  %s936_s26 = smov 16   ;;  %731 = vst [vmem:[%s1218_s15 + $0x8] sm:$0xff] %v930_v0 }
   0x4   :  { %116 = vperm.xlu0 %879, %v53_v7   ;;  %v179_v8 = vmul.f32 %v53_v7, %v53_v7  ;;  %816 = vmatprep.subr.bf16.mxu1 %v930_v0  ;;  %v55_v11 = vld [vmem:[%s1207_s2] sm:$0xff]  ;;  %v60_v15 = vld [vmem:[%s1208_s11 + $0x8] sm:$0xff]  ;;  %v370_v16 = vsub.f32 0.0, %v56_v14  ;;  %s940_s1 = smov 80   ;;  %vm732_vm8 = vcmask 31744   ;;  %vm743_vm9 = vcmask 162848  }
   0x5   :  { %830 = vmatprep.mubr.msk.bf16.mxu0 %vm931_vm1, %v930_v0  ;;  %v59_v12 = vld [vmem:[%s1208_s11] sm:$0xff]  ;;  %v369_v13 = vsub.f32 0.0, %v55_v11  ;;  %v888_v28 = vld [vmem:[%s1210_s6 + $0x8] sm:$0xff]   ;;  %s934_s11 = smov 48   ;;  %vm752_vm10 = vcmask 294048  }
   0x6   :  { %183 = vperm.xlu1 %880, %v179_v8   ;;  %813 = vmatmul.mubr.msk.bf16.vlgmr.msra.gmra.mrb[0].mxu1 %vm65_vm2, %v63_v5  ;;  %v887_v17 = vld [vmem:[%s1210_s6] sm:$0xff]  }
   0x7   :  { %818 = vmatprep.mubr.msk.bf16.mxu1 %vm931_vm1, %v930_v0  ;;  %823 = vmatpush3.bf16.msra.mxu0 %v887_v17  ;;  %v1069_v27 = vld [vmem:[%s1209_s0] sm:$0xff]  }
   0x8   :  { %121 = vperm.xlu0 %879, %v54_v9   ;;  %824 = vmatprep.subr.bf16.mxu0 %v930_v0  ;;  %v762_v37 = vld [vmem:[%s1211_s5] ss:$0 sm:$0xff] }
   0x9   :  { %v769_v61 = vld [vmem:[%s1212_s7] ss:$0 sm:$0xff] }
   0xa   :  { %188 = vperm.xlu1 %880, %v180_v10   ;;  %v891_v17 = vld [vmem:[%s1213_s8] sm:$0xff]  }
   0xb   :  { %825 = vmatpush3.bf16.msra.mxu0 %v888_v28 }
   0xc   :  { %358 = vperm.xlu0 %879, %v55_v11   ;;  %826 = vmatprep.subr.bf16.mxu0 %v930_v0 }
   0xe   :  { %363 = vperm.xlu1 %880, %v56_v14  }
   0xf   :  { %827 = vmatpush3.bf16.msra.mxu0 %v889_v29 }
  0x10   :  { %347 = vrot.lane.b32.xlu0 %v59_v12, %s933_s29  ;;  %828 = vmatprep.subr.bf16.mxu0 %v930_v0 }
  0x12   :  { %349 = vrot.lane.b32.xlu1 %v60_v15, %s933_s29 }
  0x13   :  { %829 = vmatpush3.bf16.msra.mxu0 %v890_v30 }
  0x14   :  { %414 = vperm.xlu0 %879, %v369_v13   ;;  %846 = vmatprep.subr.bf16.mxu0 %v930_v0 }
  0x16   :  { %419 = vperm.xlu1 %880, %v370_v16  }
  0x83   :  { %v117_v18 = vpop.permute.xlu0 %116 }
  0x85   :  { %v184_v31 = vpop.permute.xlu1 %183 }
  0x87   :  { %v1063_v21 = vpop.permute.xlu0 %121 }
  0x89   :  { %v189_v32 = vpop.permute.xlu1 %188 }
  0x8b   :  { %v359_v60 = vpop.permute.xlu0 %358 }
  0x8d   :  { %v364_v4 = vpop.permute.xlu1 %363 }
  0x8f   :  { %v348_v9 = vpop.permute.xlu0 %347 }
  0x91   :  { %v350_v12 = vpop.permute.xlu1 %349 }
  0xd9   :  { %v107_v19 = vpop.f32.mrb[0].mxu1 }
  0xda   :  { %v814_v20 = vpop.f32.mrb[1].mxu1  ;;  %v124_v23 = vmul.f32 %v117_v18, %v107_v19  ;;  %v191_v34 = vmul.f32 %v184_v31, %v107_v19  ;;  %v893_v19 = vld [vmem:[%s1213_s8 + $0x10] sm:$0xff]  }
  0xdb   :  { %v110_v22 = vpop.f32.mrb[2].mxu1  ;;  %v894_v20 = vld [vmem:[%s1213_s8 + $0x18] sm:$0xff]  }
  0xdc   :  { %v125_v24 = vmul.f32 %v1063_v21, %v110_v22  ;;  %v815_v25 = vpop.f32.mrb[3].mxu1  ;;  %v192_v39 = vmul.f32 %v189_v32, %v110_v22  ;;  %v896_v22 = vld [vmem:[%s1213_s8 + $0x28] sm:$0xff]  }
  0xde   :  { %v126_v26 = vpack.c.bf16 %v125_v24, %v124_v23  ;;  %v415_v24 = vpop.permute.xlu0 %414 }
  0xe0   :  { %817 = vmatpush3.bf16.msra.mxu1 %v126_v26  ;;  %v420_v26 = vpop.permute.xlu1 %419 }
  0xe1   :  { %834 = vmatprep.subr.bf16.mxu1 %v930_v0 }
  0xe3   :  { %819 = vmatmul.mubr.msk.bf16.vlgmr.msra.gmra.mrb[4].mxu1 %vm132_vm3, %v1069_v27 }
  0xe4   :  { %836 = vmatprep.mubr.msk.bf16.mxu1 %vm931_vm1, %v930_v0 }
 0x1b6   :  { %v170_v33 = vpop.f32.mrb[4].mxu1 }
 0x1b7   :  { %v177_v35 = vmul.f32 %v170_v33, %v117_v18  ;;  %v820_v36 = vpop.f32.mrb[5].mxu1 }
 0x1b8   :  { %v173_v38 = vpop.f32.mrb[6].mxu1 }
 0x1b9   :  { %v193_v40 = vadd.f32 %v191_v34, %v177_v35  ;;  %v178_v41 = vmul.f32 %v173_v38, %v1063_v21  ;;  %v821_v42 = vpop.f32.mrb[7].mxu1  ;;  %v771_v38 = vld [vmem:[%s1214_s9] ss:$0 sm:$0xff] }
 0x1bb   :  { %v202_v43 = vadd.f32 %v762_v37, %v193_v40  ;;  %v194_v44 = vadd.f32 %v192_v39, %v178_v41  ;;  %v537_v40 = vlaneseq }
 0x1bd   :  { %v203_v45 = vadd.f32 %v762_v37, %v194_v44  ;;  %v204_v46 = vmax.f32 %v202_v43, 0.0 }
 0x1bf   :  { %v205_v47 = vmax.f32 %v203_v45, 0.0 }
 0x1c1   :  { %v206_v48 = vpack.c.bf16 %v205_v47, %v204_v46  ;;  %v1141_v46 = vshrl.u32 %v537_v40, 7 }
 0x1c3   :  { %831 = vmatmul.mubr.msk.bf16.vlgmr.msra.gmra.mrb[0].mxu0 %vm239_vm4, %v206_v48  ;;  %v559_v47 = vsub.s32 1, %v1141_v46  ;;  %v1148_v48 = vld [vmem:[%s1215_s10] sm:$0x7]  ;;  %s937_s10 = smov 112  }
 0x1c4   :  { %858 = vmatprep.mubr.msk.bf16.mxu0 %vm931_vm1, %v930_v0  ;;  %847 = vmatpush3.bf16.msra.mxu0 %v891_v17 }
 0x1c5   :  { %848 = vmatprep.subr.bf16.mxu0 %v930_v0 }
 0x296   :  { %v277_v49 = vpop.f32.mrb[0].mxu0 }
 0x297   :  { %v832_v50 = vpop.f32.mrb[1].mxu0  ;;  %v284_v52 = vmul.f32 %v277_v49, %v117_v18  ;;  %v330_v57 = vmul.f32 %v277_v49, %v184_v31  ;;  %v560_v49 = vrot.slane %v1148_v48, %v559_v47 }
 0x298   :  { %v280_v51 = vpop.f32.mrb[2].mxu0 }
 0x299   :  { %v285_v53 = vmul.f32 %v280_v51, %v1063_v21  ;;  %v833_v54 = vpop.f32.mrb[3].mxu0  ;;  %v331_v63 = vmul.f32 %v280_v51, %v189_v32  ;;  %v61_v51 = vld [vmem:[%s1216_s12] sm:$0xff] }
 0x29a   :  { %v62_v54 = vld [vmem:[%s1216_s12 + $0x8] sm:$0xff] }
 0x29b   :  { %v286_v55 = vpack.c.bf16 %v285_v53, %v284_v52  ;;  %v561_v52 = vmul.f32 %v560_v49, %v61_v51 }
 0x29d   :  { %835 = vmatpush3.bf16.msra.mxu1 %v286_v55  ;;  %v562_v55 = vmul.f32 %v560_v49, %v62_v54 }
 0x29e   :  { %840 = vmatprep.subr.bf16.mxu1 %v930_v0 }
 0x2a0   :  { %837 = vmatmul.mubr.msk.bf16.vlgmr.msra.gmra.mrb[8].mxu1 %vm132_vm3, %v1069_v27 }
 0x2a1   :  { %842 = vmatprep.mubr.msk.bf16.mxu1 %vm931_vm1, %v930_v0 }
 0x373   :  { %v321_v56 = vpop.f32.mrb[8].mxu1 }
 0x374   :  { %v328_v58 = vmul.f32 %v321_v56, %v117_v18  ;;  %v838_v59 = vpop.f32.mrb[9].mxu1  ;;  %v892_v18 = vld [vmem:[%s1213_s8 + $0x8] sm:$0xff]   ;;  %v539_v56 = vsub.s32 0, %v1141_v46 }
 0x375   :  { %v324_v62 = vpop.f32.mrb[10].mxu1  ;;  %849 = vmatpush3.bf16.msra.mxu0 %v892_v18 }
 0x376   :  { %v332_v1 = vadd.f32 %v330_v57, %v328_v58  ;;  %v329_v2 = vmul.f32 %v324_v62, %v1063_v21  ;;  %v839_v3 = vpop.f32.mrb[11].mxu1  ;;  %850 = vmatprep.subr.bf16.mxu0 %v930_v0  ;;  %v895_v21 = vld [vmem:[%s1213_s8 + $0x20] sm:$0xff]   ;;  %v540_v57 = vrot.slane %v1148_v48, %v539_v56 }
 0x378   :  { %v341_v5 = vadd.f32 %v769_v61, %v332_v1  ;;  %v333_v6 = vadd.f32 %v331_v63, %v329_v2  ;;  %v541_v58 = vmul.f32 %v540_v57, %v61_v51  ;;  %v542_v59 = vmul.f32 %v540_v57, %v62_v54 }
 0x379   :  { %851 = vmatpush3.bf16.msra.mxu0 %v893_v19 }
 0x37a   :  { %v343_v7 = vmax.f32 %v341_v5, 0.0  ;;  %v342_v8 = vadd.f32 %v769_v61, %v333_v6  ;;  %852 = vmatprep.subr.bf16.mxu0 %v930_v0 }
 0x37c   :  { %v354_v10 = vsel %vm353_vm5, %v343_v7, %v348_v9  ;;  %v344_v11 = vmax.f32 %v342_v8, 0.0 }
 0x37d   :  { %v366_v14 = vmul.f32 %v359_v60, %v354_v10  ;;  %853 = vmatpush3.bf16.msra.mxu0 %v894_v20 }
 0x37e   :  { %v355_v13 = vsel %vm353_vm5, %v344_v11, %v350_v12  ;;  %854 = vmatprep.subr.bf16.mxu0 %v930_v0 }
 0x37f   :  { %v367_v15 = vmul.f32 %v364_v4, %v355_v13 }
 0x381   :  { %v368_v16 = vpack.c.bf16 %v367_v15, %v366_v14  ;;  %855 = vmatpush3.bf16.msra.mxu0 %v895_v21 }
 0x382   :  { %856 = vmatprep.subr.bf16.mxu0 %v930_v0 }
 0x383   :  { %841 = vmatpush3.bf16.msra.mxu1 %v368_v16 }
 0x384   :  { %862 = vmatprep.subr.bf16.mxu1 %v930_v0 }
 0x385   :  { %857 = vmatpush3.bf16.msra.mxu0 %v896_v22 }
 0x386   :  { %843 = vmatmul.mubr.msk.bf16.vlgmr.msra.gmra.mrb[12].mxu1 %vm132_vm3, %v1069_v27 }
 0x387   :  { %864 = vmatprep.mubr.msk.bf16.mxu1 %vm931_vm1, %v930_v0 }
 0x459   :  { %v405_v23 = vpop.f32.mrb[12].mxu1 }
 0x45a   :  { %v844_v25 = vpop.f32.mrb[13].mxu1  ;;  %v422_v28 = vmul.f32 %v415_v24, %v405_v23 }
 0x45b   :  { %v408_v27 = vpop.f32.mrb[14].mxu1 }
 0x45c   :  { %v423_v29 = vmul.f32 %v420_v26, %v408_v27  ;;  %v845_v30 = vpop.f32.mrb[15].mxu1 }
 0x45e   :  { %v881_v31 = vpack.i.bf16 %v423_v29, %v422_v28 }
 0x460   :  { %882 = vrot.lane.b32.xlu0 %v881_v31, %s934_s11  ;;  %v619_v31 = vsub.s32 2, %v1141_v46 }
 0x4d2   :  { %v883_v32 = vpop.permute.xlu0 %882 }
 0x4d3   :  { %v885_v33 = vunpack.i.h.bf16 %v883_v32  ;;  %v884_v34 = vunpack.i.l.bf16 %v883_v32  ;;  %v620_v32 = vrot.slane %v1148_v48, %v619_v31 }
 0x4d5   :  { %v434_v35 = vsel %vm432_vm6, %v355_v13, %v885_v33  ;;  %v433_v36 = vsel %vm432_vm6, %v354_v10, %v884_v34 }
 0x4d6   :  { %v435_v37 = vpack.c.bf16 %v434_v35, %v433_v36 }
 0x4d8   :  { %859 = vmatmul.mubr.msk.bf16.vlgmr.msra.gmra.mrb[4].mxu0 %vm491_vm7, %v435_v37 }
 0x5ab   :  { %v529_v39 = vpop.f32.mrb[4].mxu0 }
 0x5ac   :  { %v1136_v41 = vadd.f32 %v771_v38, %v529_v39  ;;  %v860_v42 = vpop.f32.mrb[5].mxu0 }
 0x5ad   :  { %v532_v43 = vpop.f32.mrb[6].mxu0 }
 0x5ae   :  { %898 = vtanh.f32 %v1136_v41  ;;  %v1139_v44 = vadd.f32 %v771_v38, %v532_v43  ;;  %v861_v45 = vpop.f32.mrb[7].mxu0  ;;  %v543_v60 = vadd.f32 %v541_v58, %v1136_v41 }
 0x5b0   :  { %900 = vtanh.f32 %v1139_v44  ;;  %v544_v61 = vadd.f32 %v542_v59, %v1139_v44  ;;  %v779_v62 = vmul.f32 -1.442695, %v543_v60 }
 0x5b2   :  { %v780_v63 = vmul.f32 -1.442695, %v544_v61  ;;  %902 = vpow2.f32 %v779_v62  ;;  %v785_v61 = vld [vmem:[%s1219_s14] ss:$0 sm:$0xff] }
 0x5b4   :  { %904 = vpow2.f32 %v780_v63 }
 0x5b8   :  { %v899_v50 = vpop.eup %898 }
 0x5b9   :  { %599 = vrot.lane.b32.xlu1 %v899_v50, %s935_s24 }
 0x5ba   :  { %v901_v53 = vpop.eup %900 }
 0x5bb   :  { %601 = vrot.lane.b32.xlu0 %v901_v53, %s935_s24 }
 0x5bc   :  { %v903_v1 = vpop.eup %902 }
 0x5bd   :  { %565 = vrot.lane.b32.xlu1 %v561_v52, %s936_s26  ;;  %v551_v3 = vadd.f32 1.0, %v903_v1 }
 0x5be   :  { %v905_v2 = vpop.eup %904 }
 0x5bf   :  { %567 = vrot.lane.b32.xlu0 %v562_v55, %s936_s26  ;;  %v552_v4 = vadd.f32 1.0, %v905_v2  ;;  %906 = vrcp.f32 %v551_v3 }
 0x5c1   :  { %589 = vrot.lane.b32.xlu1 %v61_v51, %s936_s26  ;;  %908 = vrcp.f32 %v552_v4  ;;  %v897_v51 = vld [vmem:[%s1217_s13] sm:$0xff]   ;;  %s939_s13 = smov 4  }
 0x5c2   :  { %863 = vmatpush3.bf16.msra.mxu1 %v897_v51 }
 0x5c3   :  { %591 = vrot.lane.b32.xlu0 %v62_v54, %s936_s26 }
 0x5c9   :  { %v907_v5 = vpop.eup %906 }
 0x5cb   :  { %v909_v8 = vpop.eup %908 }
 0x62b   :  { %v600_v6 = vpop.permute.xlu1 %599 }
 0x62c   :  { %v605_v7 = vmul.f32 %v907_v5, %v600_v6 }
 0x62d   :  { %v602_v9 = vpop.permute.xlu0 %601 }
 0x62e   :  { %v606_v10 = vmul.f32 %v909_v8, %v602_v9  ;;  %609 = vrot.lane.b32.xlu1 %v605_v7, %s936_s26 }
 0x62f   :  { %v566_v11 = vpop.permute.xlu1 %565 }
 0x630   :  { %611 = vrot.lane.b32.xlu0 %v606_v10, %s936_s26  ;;  %v571_v13 = vadd.f32 %v566_v11, %v1136_v41 }
 0x631   :  { %v568_v12 = vpop.permute.xlu0 %567 }
 0x632   :  { %v572_v14 = vadd.f32 %v568_v12, %v1139_v44  ;;  %v781_v15 = vmul.f32 -1.442695, %v571_v13 }
 0x633   :  { %v590_v22 = vpop.permute.xlu1 %589 }
 0x634   :  { %v782_v16 = vmul.f32 -1.442695, %v572_v14  ;;  %910 = vpow2.f32 %v781_v15 }
 0x635   :  { %v592_v24 = vpop.permute.xlu0 %591 }
 0x636   :  { %912 = vpow2.f32 %v782_v16 }
 0x63e   :  { %v911_v17 = vpop.eup %910 }
 0x63f   :  { %v579_v19 = vadd.f32 1.0, %v911_v17 }
 0x640   :  { %v913_v18 = vpop.eup %912 }
 0x641   :  { %v580_v20 = vadd.f32 1.0, %v913_v18  ;;  %914 = vrcp.f32 %v579_v19 }
 0x643   :  { %916 = vrcp.f32 %v580_v20 }
 0x64b   :  { %v915_v21 = vpop.eup %914 }
 0x64c   :  { %v595_v25 = vmul.f32 %v915_v21, %v590_v22 }
 0x64d   :  { %v917_v23 = vpop.eup %916 }
 0x64e   :  { %v596_v27 = vmul.f32 %v917_v23, %v592_v24 }
 0x6a0   :  { %v610_v26 = vpop.permute.xlu1 %609 }
 0x6a1   :  { %v615_v28 = vadd.f32 %v610_v26, %v595_v25 }
 0x6a2   :  { %v612_v29 = vpop.permute.xlu0 %611 }
 0x6a3   :  { %v616_v30 = vadd.f32 %v612_v29, %v596_v27  ;;  %623 = vrot.lane.b32.xlu1 %v615_v28, %s937_s10  ;;  %918 = vtanh.f32 %v615_v28 }
 0x6a5   :  { %625 = vrot.lane.b32.xlu0 %v616_v30, %s937_s10  ;;  %920 = vtanh.f32 %v616_v30 }
 0x6ad   :  { %v919_v37 = vpop.eup %918 }
 0x6af   :  { %v921_v38 = vpop.eup %920 }
 0x715   :  { %v624_v33 = vpop.permute.xlu1 %623 }
 0x716   :  { %v629_v34 = vmul.f32 %v624_v33, %v620_v32 }
 0x717   :  { %v626_v35 = vpop.permute.xlu0 %625 }
 0x718   :  { %v630_v36 = vmul.f32 %v626_v35, %v620_v32  ;;  %633 = vrot.lane.b32.xlu1 %v629_v34, %s934_s11 }
 0x71a   :  { %635 = vrot.lane.b32.xlu0 %v630_v36, %s934_s11 }
 0x71c   :  { %657 = vrot.lane.b32.xlu1 %v919_v37, %s933_s29 }
 0x71e   :  { %659 = vrot.lane.b32.xlu0 %v921_v38, %s933_s29  ;;  %s938_s29 = smov 84  }
 0x78a   :  { %v634_v39 = vpop.permute.xlu1 %633 }
 0x78b   :  { %v639_v40 = vadd.f32 %v634_v39, %v1136_v41 }
 0x78c   :  { %v636_v42 = vpop.permute.xlu0 %635 }
 0x78d   :  { %v783_v43 = vmul.f32 -1.442695, %v639_v40  ;;  %v640_v45 = vadd.f32 %v636_v42, %v1139_v44 }
 0x78e   :  { %v658_v41 = vpop.permute.xlu1 %657 }
 0x78f   :  { %922 = vpow2.f32 %v783_v43  ;;  %v784_v46 = vmul.f32 -1.442695, %v640_v45 }
 0x790   :  { %v660_v55 = vpop.permute.xlu0 %659 }
 0x791   :  { %924 = vpow2.f32 %v784_v46 }
 0x799   :  { %v923_v47 = vpop.eup %922 }
 0x79a   :  { %v647_v48 = vadd.f32 1.0, %v923_v47 }
 0x79b   :  { %v925_v49 = vpop.eup %924 }
 0x79c   :  { %926 = vrcp.f32 %v647_v48  ;;  %v648_v50 = vadd.f32 1.0, %v925_v49 }
 0x79e   :  { %928 = vrcp.f32 %v648_v50 }
 0x7a6   :  { %v927_v52 = vpop.eup %926 }
 0x7a7   :  { %v663_v53 = vmul.f32 %v927_v52, %v658_v41 }
 0x7a8   :  { %v929_v54 = vpop.eup %928 }
 0x7a9   :  { %v664_v44 = vmul.f32 %v929_v54, %v660_v55  ;;  %737 = vrot.lane.b32.xlu0 %v663_v53, %s938_s29  ;;  %v665_v56 = vmax.f32 %v663_v53, 0.0 }
 0x7ab   :  { %v666_v57 = vmax.f32 %v664_v44, 0.0 }
 0x7ad   :  { %746 = vrot.lane.b32.xlu0 %v615_v28, %s939_s13  ;;  %v667_v58 = vpack.c.bf16 %v666_v57, %v665_v56 }
 0x7af   :  { %678 = vrot.lane.b32.xlu1 %v667_v58, %s940_s1 }
 0x7b3   :  { %739 = vrot.lane.b32.xlu1 %v664_v44, %s938_s29 }
 0x7b7   :  { %748 = vrot.lane.b32.xlu1 %v616_v30, %s939_s13 }
 0x81b   :  { %v738_v60 = vpop.permute.xlu0 %737 }
 0x81f   :  { %v747_v5 = vpop.permute.xlu0 %746 }
 0x821   :  { %v679_v59 = vpop.permute.xlu1 %678 }
 0x822   :  { %865 = vmatmul.mubr.msk.bf16.vlgmr.msra.gmra.mrb[16].mxu1 %vm132_vm3, %v679_v59 }
 0x825   :  { %v740_v62 = vpop.permute.xlu1 %739 }
 0x829   :  { %v749_v6 = vpop.permute.xlu1 %748 }
 0x8f5   :  { %v723_v63 = vpop.f32.mrb[16].mxu1 }
 0x8f6   :  { %v724_v0 = vadd.f32 %v785_v61, %v723_v63  ;;  %v866_v1 = vpop.f32.mrb[17].mxu1 }
 0x8f7   :  { %v726_v2 = vpop.f32.mrb[18].mxu1 }
 0x8f8   :  { %733 = vst.msk [vmem:[%s1218_s15] sm:$0xff] %vm732_vm8, %v724_v0  ;;  %v727_v3 = vadd.f32 %v785_v61, %v726_v2  ;;  %v867_v4 = vpop.f32.mrb[19].mxu1 }
 0x8f9   :  { %744 = vst.msk [vmem:[%s1218_s15] sm:$0xff] %vm743_vm9, %v738_v60 }
 0x8fa   :  { %753 = vst.msk [vmem:[%s1218_s15] sm:$0xff] %vm752_vm10, %v747_v5 }
 0x8fb   :  { %734 = vst.msk [vmem:[%s1218_s15 + $0x8] sm:$0xff] %vm732_vm8, %v727_v3 }
 0x8fc   :  { %745 = vst.msk [vmem:[%s1218_s15 + $0x8] sm:$0xff] %vm743_vm9, %v740_v62 }
 0x8fd   :  { %754 = vst.msk [vmem:[%s1218_s15 + $0x8] sm:$0xff] %vm752_vm10, %v749_v6 }

</bundles_post_ra>
